<compile_context>
chip_gen: v7x
topology: tpu7x:2x2x1
jax: 0.10.0
libtpu: 0.0.40
codegen_flags: <defaults>
</compile_context>

<pallas_src>
import jax
import jax.numpy as jnp
from jax.experimental import pallas as pl
from jax.experimental.pallas import tpu as pltpu


def l1_loss_pallas(output, mask, ind, target, *, hw_chunk=2048):
    """output: (B, C, H, W) (NCHW, any float dtype); mask: (B, K); ind: (B, K) int;
    target: (B, K, C). Returns scalar mean L1 loss (reduction='elementwise_mean')."""
    B, C, H, W = output.shape
    K = ind.shape[1]
    HW = H * W

    # Free view of the contiguous NCHW layout — no transpose, NO dtype cast here.
    feat = output.reshape(B, C, HW)

    # Tiny O(B*K*C) layout plumbing: indices/mask/target as (K, 1) sublane columns.
    idx = jnp.clip(ind.astype(jnp.int32), 0, HW - 1).reshape(B, K, 1)
    tgt = jnp.transpose(target.astype(jnp.float32), (0, 2, 1)).reshape(B, C * K, 1)
    msk = mask.astype(jnp.float32).reshape(B, K, 1)

    # Two independent accumulator blocks when B is even => v7x can shard the leading
    # "parallel" axis across its two TensorCores; on v5e/v6e this is a no-op.
    nc = 2 if (B % 2 == 0 and B >= 2) else 1
    bb = B // nc
    inv_norm = 1.0 / float(B * K * C)

    def kernel(feat_ref, ind_ref, tgt_ref, mask_ref, out_ref):
        # feat_ref: (1, C, HW) in output dtype — one batch's feature slab (streamed DMA)
        # ind_ref : (1, K, 1) int32
        # tgt_ref : (1, C*K, 1) f32   (channel-major columns)
        # mask_ref: (1, K, 1) f32
        # out_ref : (1, 1, 1) f32 accumulator block, resident across the batch axis
        b = pl.program_id(1)

        @pl.when(b == 0)
        def _init():
            out_ref[...] = jnp.zeros_like(out_ref)

        idx_col = ind_ref[0]                                   # (K, 1) int32

        # Fused gather: pred[c, k] = feat[c, ind[k]], computed as an exact
        # one-hot select + lane reduction, chunked over HW.
        pred = [jnp.zeros((K, 1), jnp.float32) for _ in range(C)]
        for lo in range(0, HW, hw_chunk):
            hi = min(lo + hw_chunk, HW)
            t = hi - lo
            # Cast happens here, on the VMEM tile only (no HBM f32 copy).
            fchunk = feat_ref[0, :, lo:hi].astype(jnp.float32)  # (C, t)
            pos = jax.lax.broadcasted_iota(jnp.int32, (K, t), 1) + lo
            hit = pos == idx_col                                # (K, t), shared over C
            for c in range(C):
                row = jnp.broadcast_to(fchunk[c:c + 1, :], (K, t))
                sel = jnp.where(hit, row, jnp.float32(0.0))
                pred[c] = pred[c] + jnp.sum(sel, axis=1, keepdims=True)

        # Masked L1 partial sum for this batch: |(pred - tgt) * m| == |pred*m - tgt*m|.
        m = mask_ref[0]                                         # (K, 1)
        part = jnp.zeros((), jnp.float32)
        for c in range(C):
            tgt_c = tgt_ref[0, c * K:(c + 1) * K, :]            # (K, 1)
            part = part + jnp.sum(jnp.abs((pred[c] - tgt_c) * m))

        out_ref[...] += part

        # Fold the 'elementwise_mean' normalization into the kernel epilogue.
        @pl.when(b == pl.num_programs(1) - 1)
        def _finalize():
            out_ref[...] = out_ref[...] * inv_norm

    partials = pl.pallas_call(
        kernel,
        out_shape=jax.ShapeDtypeStruct((nc, 1, 1), jnp.float32),
        grid=(nc, bb),
        in_specs=[
            pl.BlockSpec((1, C, HW), lambda c, b: (c * bb + b, 0, 0)),
            pl.BlockSpec((1, K, 1), lambda c, b: (c * bb + b, 0, 0)),
            pl.BlockSpec((1, C * K, 1), lambda c, b: (c * bb + b, 0, 0)),
            pl.BlockSpec((1, K, 1), lambda c, b: (c * bb + b, 0, 0)),
        ],
        out_specs=pl.BlockSpec((1, 1, 1), lambda c, b: (c, 0, 0)),
        compiler_params=pltpu.CompilerParams(
            # Leading axis: independent accumulators (megacore on v7x).
            # Batch axis: reduction into the resident output block.
            dimension_semantics=("parallel", "arbitrary"),
        ),
    )(feat, idx, tgt, msk)

    # Only nc (<= 2) already-normalized partials remain; this add is negligible.
    return jnp.sum(partials)


def _l1_loss_reference(output, mask, ind, target):
    B, C, H, W = output.shape
    feat = jnp.transpose(output, (0, 2, 3, 1)).reshape(B, H * W, C)
    pred = jnp.take_along_axis(feat, ind[:, :, None].astype(jnp.int32), axis=1)
    m = mask.astype(jnp.float32)[:, :, None]
    return jnp.mean(jnp.abs(pred * m - target * m))


if __name__ == "__main__":
    B, C, H, W, K = 2, 4, 16, 16, 8
    key = jax.random.PRNGKey(0)
    k1, k2, k3, k4 = jax.random.split(key, 4)

    output = jax.random.normal(k1, (B, C, H, W), dtype=jnp.float32)
    target = jax.random.normal(k2, (B, K, C), dtype=jnp.float32)
    ind = jax.random.randint(k3, (B, K), 0, H * W, dtype=jnp.int32)
    mask = (jax.random.uniform(k4, (B, K)) > 0.3).astype(jnp.float32)

    loss = l1_loss_pallas(output, mask, ind, target)
    loss = jax.block_until_ready(loss)

    ref = _l1_loss_reference(output, mask, ind, target)
    assert jnp.allclose(loss, ref, rtol=1e-5, atol=1e-6), (loss, ref)
    print("KERNEL_OK")
</pallas_src>

<mosaic_0001>
module attributes {stable_mosaic.version = 11 : i64} {
  func.func @kernel(%arg0: i32, %arg1: i32, %arg2: memref<1x4x256xf32, #tpu.memory_space<vmem>>, %arg3: memref<1x8x1xi32, #tpu.memory_space<vmem>>, %arg4: memref<1x32x1xf32, #tpu.memory_space<vmem>>, %arg5: memref<1x8x1xf32, #tpu.memory_space<vmem>>, %arg6: memref<1x1x1xf32, #tpu.memory_space<vmem>>) attributes {dimension_semantics = [#tpu.dimension_semantics<parallel>, #tpu.dimension_semantics<arbitrary>], iteration_bounds = array<i64: 2, 1>, scalar_prefetch = 0 : i64, scratch_operands = 0 : i64, tpu.core_type = #tpu.core_type<tc>, window_params = [{transform_indices = @transform_0, window_bounds = array<i64: 1, 4, 256>}, {transform_indices = @transform_1, window_bounds = array<i64: 1, 8, 1>}, {transform_indices = @transform_2, window_bounds = array<i64: 1, 32, 1>}, {transform_indices = @transform_3, window_bounds = array<i64: 1, 8, 1>}, {transform_indices = @transform_4, window_bounds = array<i64: 1, 1, 1>}]} {
    %c0_i32 = arith.constant 0 : i32
    %0 = arith.cmpi eq, %arg1, %c0_i32 : i32
    %1 = arith.extui %0 : i1 to i32
    %c0_i32_0 = arith.constant 0 : i32
    %2 = arith.cmpi ne, %1, %c0_i32_0 : i32
    scf.if %2 {
      %cst_43 = arith.constant 0.000000e+00 : f32
      %97 = vector.broadcast %cst_43 : f32 to vector<1x1x1xf32>
      %c0_44 = arith.constant 0 : index
      %c0_45 = arith.constant 0 : index
      %c0_46 = arith.constant 0 : index
      %98 = vector.load %arg6[%c0_44, %c0_45, %c0_46] : memref<1x1x1xf32, #tpu.memory_space<vmem>>, vector<1x1x1xf32>
      tpu.vector_store %arg6[%c0_44, %c0_45, %c0_46], %97 {strides = array<i32>} : memref<1x1x1xf32, #tpu.memory_space<vmem>>, vector<1x1x1xf32>,
    } else {
    }
    %c0 = arith.constant 0 : index
    %c0_1 = arith.constant 0 : index
    %c0_2 = arith.constant 0 : index
    %3 = vector.load %arg3[%c0, %c0_1, %c0_2] : memref<1x8x1xi32, #tpu.memory_space<vmem>>, vector<1x8x1xi32>
    %4 = vector.shape_cast %3 : vector<1x8x1xi32> to vector<8x1xi32>
    %cst = arith.constant 0.000000e+00 : f32
    %5 = vector.broadcast %cst : f32 to vector<8x1xf32>
    %cst_3 = arith.constant 0.000000e+00 : f32
    %6 = vector.broadcast %cst_3 : f32 to vector<8x1xf32>
    %cst_4 = arith.constant 0.000000e+00 : f32
    %7 = vector.broadcast %cst_4 : f32 to vector<8x1xf32>
    %cst_5 = arith.constant 0.000000e+00 : f32
    %8 = vector.broadcast %cst_5 : f32 to vector<8x1xf32>
    %c0_6 = arith.constant 0 : index
    %c0_7 = arith.constant 0 : index
    %c0_8 = arith.constant 0 : index
    %9 = vector.load %arg2[%c0_6, %c0_7, %c0_8] : memref<1x4x256xf32, #tpu.memory_space<vmem>>, vector<1x4x256xf32>
    %10 = vector.shape_cast %9 : vector<1x4x256xf32> to vector<4x256xf32>
    %11 = tpu.iota {dimensions = array<i32: 1>} : vector<8x256xi32>
    %c0_i32_9 = arith.constant 0 : i32
    %12 = vector.broadcast %c0_i32_9 : i32 to vector<8x256xi32>
    %13 = arith.addi %11, %12 : vector<8x256xi32>
    %14 = vector.broadcast %4 : vector<8x1xi32> to vector<8x256xi32>
    %15 = arith.cmpi eq, %13, %14 : vector<8x256xi32>
    %16 = vector.extract_strided_slice %10 {offsets = [0, 0], sizes = [1, 256], strides = [1, 1]} : vector<4x256xf32> to vector<1x256xf32>
    %17 = vector.shape_cast %16 : vector<1x256xf32> to vector<1x256xf32>
    %18 = vector.broadcast %17 : vector<1x256xf32> to vector<8x256xf32>
    %cst_10 = arith.constant 0.000000e+00 : f32
    %19 = vector.broadcast %cst_10 : f32 to vector<8x256xf32>
    %20 = arith.select %15, %18, %19 : vector<8x256xi1>, vector<8x256xf32>
    %cst_11 = arith.constant dense<0.000000e+00> : vector<8xf32>
    %21 = vector.multi_reduction <add>, %20, %cst_11 [1] : vector<8x256xf32> to vector<8xf32>
    %22 = vector.shape_cast %21 : vector<8xf32> to vector<8x1xf32>
    %23 = arith.addf %5, %22 : vector<8x1xf32>
    %24 = vector.extract_strided_slice %10 {offsets = [1, 0], sizes = [1, 256], strides = [1, 1]} : vector<4x256xf32> to vector<1x256xf32>
    %25 = vector.shape_cast %24 : vector<1x256xf32> to vector<1x256xf32>
    %26 = vector.broadcast %25 : vector<1x256xf32> to vector<8x256xf32>
    %cst_12 = arith.constant 0.000000e+00 : f32
    %27 = vector.broadcast %cst_12 : f32 to vector<8x256xf32>
    %28 = arith.select %15, %26, %27 : vector<8x256xi1>, vector<8x256xf32>
    %cst_13 = arith.constant dense<0.000000e+00> : vector<8xf32>
    %29 = vector.multi_reduction <add>, %28, %cst_13 [1] : vector<8x256xf32> to vector<8xf32>
    %30 = vector.shape_cast %29 : vector<8xf32> to vector<8x1xf32>
    %31 = arith.addf %6, %30 : vector<8x1xf32>
    %32 = vector.extract_strided_slice %10 {offsets = [2, 0], sizes = [1, 256], strides = [1, 1]} : vector<4x256xf32> to vector<1x256xf32>
    %33 = vector.shape_cast %32 : vector<1x256xf32> to vector<1x256xf32>
    %34 = vector.broadcast %33 : vector<1x256xf32> to vector<8x256xf32>
    %cst_14 = arith.constant 0.000000e+00 : f32
    %35 = vector.broadcast %cst_14 : f32 to vector<8x256xf32>
    %36 = arith.select %15, %34, %35 : vector<8x256xi1>, vector<8x256xf32>
    %cst_15 = arith.constant dense<0.000000e+00> : vector<8xf32>
    %37 = vector.multi_reduction <add>, %36, %cst_15 [1] : vector<8x256xf32> to vector<8xf32>
    %38 = vector.shape_cast %37 : vector<8xf32> to vector<8x1xf32>
    %39 = arith.addf %7, %38 : vector<8x1xf32>
    %40 = vector.extract_strided_slice %10 {offsets = [3, 0], sizes = [1, 256], strides = [1, 1]} : vector<4x256xf32> to vector<1x256xf32>
    %41 = vector.shape_cast %40 : vector<1x256xf32> to vector<1x256xf32>
    %42 = vector.broadcast %41 : vector<1x256xf32> to vector<8x256xf32>
    %cst_16 = arith.constant 0.000000e+00 : f32
    %43 = vector.broadcast %cst_16 : f32 to vector<8x256xf32>
    %44 = arith.select %15, %42, %43 : vector<8x256xi1>, vector<8x256xf32>
    %cst_17 = arith.constant dense<0.000000e+00> : vector<8xf32>
    %45 = vector.multi_reduction <add>, %44, %cst_17 [1] : vector<8x256xf32> to vector<8xf32>
    %46 = vector.shape_cast %45 : vector<8xf32> to vector<8x1xf32>
    %47 = arith.addf %8, %46 : vector<8x1xf32>
    %c0_18 = arith.constant 0 : index
    %c0_19 = arith.constant 0 : index
    %c0_20 = arith.constant 0 : index
    %48 = vector.load %arg5[%c0_18, %c0_19, %c0_20] : memref<1x8x1xf32, #tpu.memory_space<vmem>>, vector<1x8x1xf32>
    %49 = vector.shape_cast %48 : vector<1x8x1xf32> to vector<8x1xf32>
    %c0_21 = arith.constant 0 : index
    %c0_22 = arith.constant 0 : index
    %c0_23 = arith.constant 0 : index
    %50 = vector.load %arg4[%c0_21, %c0_22, %c0_23] : memref<1x32x1xf32, #tpu.memory_space<vmem>>, vector<1x8x1xf32>
    %51 = vector.shape_cast %50 : vector<1x8x1xf32> to vector<8x1xf32>
    %52 = arith.subf %23, %51 : vector<8x1xf32>
    %53 = arith.mulf %52, %49 : vector<8x1xf32>
    %54 = math.absf %53 : vector<8x1xf32>
    %55 = vector.shape_cast %54 : vector<8x1xf32> to vector<1x8x1xf32>
    %cst_24 = arith.constant dense<0.000000e+00> : vector<1xf32>
    %56 = vector.multi_reduction <add>, %55, %cst_24 [1, 2] : vector<1x8x1xf32> to vector<1xf32>
    %57 = vector.shape_cast %56 : vector<1xf32> to vector<1x1x1xf32>
    %58 = vector.extract %57[0, 0, 0] : f32 from vector<1x1x1xf32>
    %cst_25 = arith.constant 0.000000e+00 : f32
    %59 = arith.addf %cst_25, %58 : f32
    %c0_26 = arith.constant 0 : index
    %c8 = arith.constant 8 : index
    %c0_27 = arith.constant 0 : index
    %60 = vector.load %arg4[%c0_26, %c8, %c0_27] : memref<1x32x1xf32, #tpu.memory_space<vmem>>, vector<1x8x1xf32>
    %61 = vector.shape_cast %60 : vector<1x8x1xf32> to vector<8x1xf32>
    %62 = arith.subf %31, %61 : vector<8x1xf32>
    %63 = arith.mulf %62, %49 : vector<8x1xf32>
    %64 = math.absf %63 : vector<8x1xf32>
    %65 = vector.shape_cast %64 : vector<8x1xf32> to vector<1x8x1xf32>
    %cst_28 = arith.constant dense<0.000000e+00> : vector<1xf32>
    %66 = vector.multi_reduction <add>, %65, %cst_28 [1, 2] : vector<1x8x1xf32> to vector<1xf32>
    %67 = vector.shape_cast %66 : vector<1xf32> to vector<1x1x1xf32>
    %68 = vector.extract %67[0, 0, 0] : f32 from vector<1x1x1xf32>
    %69 = arith.addf %59, %68 : f32
    %c0_29 = arith.constant 0 : index
    %c16 = arith.constant 16 : index
    %c0_30 = arith.constant 0 : index
    %70 = vector.load %arg4[%c0_29, %c16, %c0_30] : memref<1x32x1xf32, #tpu.memory_space<vmem>>, vector<1x8x1xf32>
    %71 = vector.shape_cast %70 : vector<1x8x1xf32> to vector<8x1xf32>
    %72 = arith.subf %39, %71 : vector<8x1xf32>
    %73 = arith.mulf %72, %49 : vector<8x1xf32>
    %74 = math.absf %73 : vector<8x1xf32>
    %75 = vector.shape_cast %74 : vector<8x1xf32> to vector<1x8x1xf32>
    %cst_31 = arith.constant dense<0.000000e+00> : vector<1xf32>
    %76 = vector.multi_reduction <add>, %75, %cst_31 [1, 2] : vector<1x8x1xf32> to vector<1xf32>
    %77 = vector.shape_cast %76 : vector<1xf32> to vector<1x1x1xf32>
    %78 = vector.extract %77[0, 0, 0] : f32 from vector<1x1x1xf32>
    %79 = arith.addf %69, %78 : f32
    %c0_32 = arith.constant 0 : index
    %c24 = arith.constant 24 : index
    %c0_33 = arith.constant 0 : index
    %80 = vector.load %arg4[%c0_32, %c24, %c0_33] : memref<1x32x1xf32, #tpu.memory_space<vmem>>, vector<1x8x1xf32>
    %81 = vector.shape_cast %80 : vector<1x8x1xf32> to vector<8x1xf32>
    %82 = arith.subf %47, %81 : vector<8x1xf32>
    %83 = arith.mulf %82, %49 : vector<8x1xf32>
    %84 = math.absf %83 : vector<8x1xf32>
    %85 = vector.shape_cast %84 : vector<8x1xf32> to vector<1x8x1xf32>
    %cst_34 = arith.constant dense<0.000000e+00> : vector<1xf32>
    %86 = vector.multi_reduction <add>, %85, %cst_34 [1, 2] : vector<1x8x1xf32> to vector<1xf32>
    %87 = vector.shape_cast %86 : vector<1xf32> to vector<1x1x1xf32>
    %88 = vector.extract %87[0, 0, 0] : f32 from vector<1x1x1xf32>
    %89 = arith.addf %79, %88 : f32
    %c0_35 = arith.constant 0 : index
    %c0_36 = arith.constant 0 : index
    %c0_37 = arith.constant 0 : index
    %90 = vector.load %arg6[%c0_35, %c0_36, %c0_37] : memref<1x1x1xf32, #tpu.memory_space<vmem>>, vector<1x1x1xf32>
    %91 = vector.broadcast %89 : f32 to vector<1x1x1xf32>
    %92 = arith.addf %90, %91 : vector<1x1x1xf32>
    %c0_38 = arith.constant 0 : index
    %c0_39 = arith.constant 0 : index
    %c0_40 = arith.constant 0 : index
    %93 = vector.load %arg6[%c0_38, %c0_39, %c0_40] : memref<1x1x1xf32, #tpu.memory_space<vmem>>, vector<1x1x1xf32>
    tpu.vector_store %arg6[%c0_38, %c0_39, %c0_40], %92 {strides = array<i32>} : memref<1x1x1xf32, #tpu.memory_space<vmem>>, vector<1x1x1xf32>,
    %c0_i32_41 = arith.constant 0 : i32
    %94 = arith.cmpi eq, %arg1, %c0_i32_41 : i32
    %95 = arith.extui %94 : i1 to i32
    %c0_i32_42 = arith.constant 0 : i32
    %96 = arith.cmpi ne, %95, %c0_i32_42 : i32
    scf.if %96 {
      %c0_43 = arith.constant 0 : index
      %c0_44 = arith.constant 0 : index
      %c0_45 = arith.constant 0 : index
      %97 = vector.load %arg6[%c0_43, %c0_44, %c0_45] : memref<1x1x1xf32, #tpu.memory_space<vmem>>, vector<1x1x1xf32>
      %cst_46 = arith.constant 1.562500e-02 : f32
      %98 = vector.broadcast %cst_46 : f32 to vector<1x1x1xf32>
      %99 = arith.mulf %97, %98 : vector<1x1x1xf32>
      %c0_47 = arith.constant 0 : index
      %c0_48 = arith.constant 0 : index
      %c0_49 = arith.constant 0 : index
      %100 = vector.load %arg6[%c0_47, %c0_48, %c0_49] : memref<1x1x1xf32, #tpu.memory_space<vmem>>, vector<1x1x1xf32>
      tpu.vector_store %arg6[%c0_47, %c0_48, %c0_49], %99 {strides = array<i32>} : memref<1x1x1xf32, #tpu.memory_space<vmem>>, vector<1x1x1xf32>,
    } else {
    }
    return
  }
  func.func @transform_0(%arg0: i32, %arg1: i32) -> (i32, i32, i32) {
    %c1_i32 = arith.constant 1 : i32
    %0 = arith.muli %arg0, %c1_i32 : i32
    %1 = arith.addi %0, %arg1 : i32
    %c0_i32 = arith.constant 0 : i32
    %c0_i32_0 = arith.constant 0 : i32
    %c0_i32_1 = arith.constant 0 : i32
    return %1, %c0_i32, %c0_i32_0 : i32, i32, i32
  }
  func.func @transform_1(%arg0: i32, %arg1: i32) -> (i32, i32, i32) {
    %c1_i32 = arith.constant 1 : i32
    %0 = arith.muli %arg0, %c1_i32 : i32
    %1 = arith.addi %0, %arg1 : i32
    %c0_i32 = arith.constant 0 : i32
    %c0_i32_0 = arith.constant 0 : i32
    %c0_i32_1 = arith.constant 0 : i32
    return %1, %c0_i32, %c0_i32_0 : i32, i32, i32
  }
  func.func @transform_2(%arg0: i32, %arg1: i32) -> (i32, i32, i32) {
    %c1_i32 = arith.constant 1 : i32
    %0 = arith.muli %arg0, %c1_i32 : i32
    %1 = arith.addi %0, %arg1 : i32
    %c0_i32 = arith.constant 0 : i32
    %c0_i32_0 = arith.constant 0 : i32
    %c0_i32_1 = arith.constant 0 : i32
    return %1, %c0_i32, %c0_i32_0 : i32, i32, i32
  }
  func.func @transform_3(%arg0: i32, %arg1: i32) -> (i32, i32, i32) {
    %c1_i32 = arith.constant 1 : i32
    %0 = arith.muli %arg0, %c1_i32 : i32
    %1 = arith.addi %0, %arg1 : i32
    %c0_i32 = arith.constant 0 : i32
    %c0_i32_0 = arith.constant 0 : i32
    %c0_i32_1 = arith.constant 0 : i32
    return %1, %c0_i32, %c0_i32_0 : i32, i32, i32
  }
  func.func @transform_4(%arg0: i32, %arg1: i32) -> (i32, i32, i32) {
    %c0_i32 = arith.constant 0 : i32
    %c0_i32_0 = arith.constant 0 : i32
    %c0_i32_1 = arith.constant 0 : i32
    return %arg0, %c0_i32, %c0_i32_0 : i32, i32, i32
  }
}

</mosaic_0001>

<bundles_post_ra>
// kernel: tpu_custom_call.1
= control target key start
LH: loop header
LB: loop body
LE: loop exit
PB: predicated region body
PF: predicated region fallthrough
CT: control target
= control target key end

     0   :  { %s666_s15 = smov 0   ;;  %s668_s16 = smov 0   ;;  %s732_s0 = inlined_call_operand.vmem [shape: f32[2,4,256], index: 0, kind: input, shape index: {}]   ;;  %s733_s1 = inlined_call_operand.vmem [shape: s32[2,8,1], index: 1, kind: input, shape index: {}]   ;;  %s734_s2 = inlined_call_operand.vmem [shape: f32[2,32,1], index: 2, kind: input, shape index: {}]   ;;  %s735_s3 = inlined_call_operand.vmem [shape: f32[2,8,1], index: 3, kind: input, shape index: {}]   ;;  %s736_s4 = inlined_call_operand.vmem [shape: f32[2,1,1], index: 4, kind: output, shape index: {}]  }
   0x1   :  { %s670_s17 = smov 0  }
   0x2 LB: > { %s26_s18 = sadd.s32 1, %s633_s16  ;;  %p569_p0 = scmp.ge.s32.totalorder %s637_s17, 1  ;;  %s637_s17 = sphi %s670_s17, %s14_s17   ;;  %s633_s16 = sphi %s668_s16, %s738_s16   ;;  %s629_s15 = sphi %s666_s15, %s737_s15  }
   0x3   : > { %p28_p1 = scmp.ge.s32.totalorder %s26_s18, 2  ;;  %p218_p2 = scmp.lt.s32.totalorder %s637_s17, 3 }
   0x5   : > { %s740_s18 = smov (%p28_p1, %s26_s18), 0  ;;  %p219_p3 = pnand %p569_p0, %p218_p2 }
   0x6   : > { %p260_p4 = scmp.lt.s32.totalorder (!%p219_p3), %s629_s15, 1  ;;  %v639_v0 = vmov (!%p219_p3), 0   ;;  %v296_v2 = vlaneseq (!%p219_p3)  ;;  %vm406_vm2 = vcmask (!%p219_p3), 7168   ;;  %vm292_vm3 = vcmask (!%p219_p3), 0  }
   0x7   : > { %222 = sbr.rel (%p219_p3) target bundleno = 531 (0x213), region = 36  ;;  %614 = vset.pattern.permute.xlu0 (!%p219_p3), %v639_v0 }
   0x8   : > { %v306_v3 = vshrl.u32 (!%p219_p3), %v296_v2, 7  ;;  %v297_v11 = vand.u32 (!%p219_p3), 127, %v296_v2 }
   0xa   : > { %v331_v4 = vsub.s32 (!%p219_p3), 1, %v306_v3  ;;  %v335_v5 = vsub.s32 (!%p219_p3), 5, %v306_v3  ;;  %v307_v6 = vsub.s32 (!%p219_p3), 0, %v306_v3  ;;  %v311_v7 = vsub.s32 (!%p219_p3), 4, %v306_v3 }
   0xb   : > { %v355_v9 = vsub.s32 (!%p219_p3), 2, %v306_v3  ;;  %v359_v10 = vsub.s32 (!%p219_p3), 6, %v306_v3  ;;  %v379_v18 = vsub.s32 (!%p219_p3), 3, %v306_v3  ;;  %v383_v19 = vsub.s32 (!%p219_p3), 7, %v306_v3 }
   0xc   : > { %v298_v20 = vadd.s32 (!%p219_p3), 128, %v297_v11 }
   0xe   : > { %s742_s15 = smov (!%p260_p4, %s629_s15), 1 }
   0xf   : > { %s687_s19 = sshll.u32 %s742_s15, 3  ;;  %s579_s26 = sshll.u32 %s742_s15, 5 }
  0x10   : > { %s270_s22 = scalar_lea.vmem %s733_s1, %s687_s19  ;;  %s264_s25 = scalar_lea.vmem %s732_s0, %s687_s19 }
  0x11   : > { %v294_v1 = vld [vmem:[%s270_s22] sm:$0xff]  ;;  %s277_s29 = scalar_lea.vmem %s734_s2, %s579_s26  ;;  %s283_s6 = scalar_lea.vmem %s735_s3, %s687_s19 }
  0x12   : > { %300 = vperm.xlu0 %614, %v294_v1   ;;  %v295_v8 = vld [vmem:[%s264_s25] sm:$0xff]  ;;  %v418_v44 = vld [vmem:[%s277_s29 + $0x8] sm:$0xff]  ;;  %v433_v51 = vld [vmem:[%s277_s29 + $0x10] sm:$0xff]  ;;  %s713_s9 = scalar_lea.vmem %s736_s4, %s742_s15 }
  0x13   : > { %v332_v12 = vrot.slane %v295_v8, %v331_v4  ;;  %v336_v13 = vrot.slane %v295_v8, %v335_v5  ;;  %v308_v14 = vrot.slane %v295_v8, %v307_v6  ;;  %v312_v15 = vrot.slane %v295_v8, %v311_v7  ;;  %v402_v45 = vld [vmem:[%s277_s29] sm:$0xff]  ;;  %v448_v57 = vld [vmem:[%s277_s29 + $0x18] sm:$0xff] }
  0x14   : > { %v356_v16 = vrot.slane %v295_v8, %v355_v9  ;;  %v360_v17 = vrot.slane %v295_v8, %v359_v10  ;;  %v380_v28 = vrot.slane %v295_v8, %v379_v18  ;;  %v384_v29 = vrot.slane %v295_v8, %v383_v19  ;;  %v401_v46 = vld [vmem:[%s283_s6] sm:$0xff] }
  0x15   : > { %v342_v21 = vrot.slane %v332_v12, %v331_v4  ;;  %v346_v22 = vrot.slane %v336_v13, %v331_v4  ;;  %v318_v23 = vrot.slane %v308_v14, %v307_v6  ;;  %v322_v24 = vrot.slane %v312_v15, %v307_v6 }
  0x16   : > { %v366_v26 = vrot.slane %v356_v16, %v355_v9  ;;  %v370_v27 = vrot.slane %v360_v17, %v355_v9  ;;  %v390_v38 = vrot.slane %v380_v28, %v379_v18  ;;  %v394_v39 = vrot.slane %v384_v29, %v379_v18 }
  0x17   : > { %v640_v5 = vmov 0.0  }
  0x18   : > { %293 = vst.msk [vmem:[%s713_s9] sm:$0x1] %vm292_vm3, %v640_v5 }
  0x91   : > { %v301_v25 = vpop.permute.xlu0 %300 }
  0x92   : > { %vm302_vm0 = vcmp.eq.s32.totalorder %v297_v11, %v301_v25  ;;  %vm303_vm1 = vcmp.eq.s32.totalorder %v298_v20, %v301_v25 }
  0x93   : > { %v347_v30 = vsel %vm302_vm0, %v342_v21, 0.0  ;;  %v348_v31 = vsel %vm303_vm1, %v346_v22, 0.0  ;;  %v323_v32 = vsel %vm302_vm0, %v318_v23, 0.0  ;;  %v324_v33 = vsel %vm303_vm1, %v322_v24, 0.0 }
  0x94   : > { %v349_v34 = vadd.f32 %v348_v31, %v347_v30  ;;  %v325_v35 = vadd.f32 %v324_v33, %v323_v32  ;;  %v371_v36 = vsel %vm302_vm0, %v366_v26, 0.0  ;;  %v372_v37 = vsel %vm303_vm1, %v370_v27, 0.0 }
  0x95   : > { %v373_v40 = vadd.f32 %v372_v37, %v371_v36  ;;  %v395_v41 = vsel %vm302_vm0, %v390_v38, 0.0  ;;  %v396_v42 = vsel %vm303_vm1, %v394_v39, 0.0 }
  0x96   : > { %350 = vadd.xlane.f32.xlu1 %v349_v34  ;;  %326 = vadd.xlane.f32.xlu0 %v325_v35  ;;  %v397_v43 = vadd.f32 %v396_v42, %v395_v41  ;;  %v463_v34 = vld [vmem:[%s713_s9] sm:$0x1] }
  0x9a   : > { %374 = vadd.xlane.f32.xlu1 %v373_v40 }
  0x9e   : > { %398 = vadd.xlane.f32.xlu1 %v397_v43 }
 0x123   : > { %v351_v47 = vpop.xlane.xlu1 %350  ;;  %v327_v48 = vpop.xlane.xlu0 %326 }
 0x124   : > { %v419_v49 = vsub.f32 %v351_v47, %v418_v44  ;;  %v403_v50 = vsub.f32 %v327_v48, %v402_v45 }
 0x126   : > { %v420_v52 = vmul.f32 %v419_v49, %v401_v46  ;;  %v404_v53 = vmul.f32 %v403_v50, %v401_v46 }
 0x127   : > { %v375_v54 = vpop.xlane.xlu1 %374 }
 0x128   : > { %v434_v55 = vsub.f32 %v375_v54, %v433_v51  ;;  %v405_v56 = vand.u32 2147483647, %v404_v53  ;;  %v421_v60 = vand.u32 2147483647, %v420_v52 }
 0x12a   : > { %v435_v58 = vmul.f32 %v434_v55, %v401_v46  ;;  %v407_v59 = vsel %vm406_vm2, %v405_v56, 0.0  ;;  %v422_v0 = vsel %vm406_vm2, %v421_v60, 0.0 }
 0x12b   : > { %v399_v61 = vpop.xlane.xlu1 %398  ;;  %408 = vadd.xlane.f32.xlu1 %v407_v59 }
 0x12c   : > { %v449_v62 = vsub.f32 %v399_v61, %v448_v57  ;;  %v436_v1 = vand.u32 2147483647, %v435_v58 }
 0x12e   : > { %v450_v63 = vmul.f32 %v449_v62, %v401_v46  ;;  %v437_v2 = vsel %vm406_vm2, %v436_v1, 0.0 }
 0x12f   : > { %423 = vadd.xlane.f32.xlu1 %v422_v0 }
 0x130   : > { %v451_v3 = vand.u32 2147483647, %v450_v63 }
 0x132   : > { %v452_v4 = vsel %vm406_vm2, %v451_v3, 0.0 }
 0x133   : > { %438 = vadd.xlane.f32.xlu1 %v437_v2 }
 0x137   : > { %453 = vadd.xlane.f32.xlu1 %v452_v4 }
 0x1b8   : > { %v409_v6 = vpop.xlane.xlu1 %408 }
 0x1b9   : > { %v410_v7 = vrot.slane %v409_v6, 4 }
 0x1bb   : > { %v411_v8 = vadd.f32 %v410_v7, %v409_v6 }
 0x1bc   : > { %v424_v9 = vpop.xlane.xlu1 %423 }
 0x1bd   : > { %v412_v10 = vrot.slane %v411_v8, 2  ;;  %v425_v11 = vrot.slane %v424_v9, 4 }
 0x1bf   : > { %v426_v12 = vadd.f32 %v425_v11, %v424_v9  ;;  %v413_v13 = vadd.f32 %v412_v10, %v411_v8 }
 0x1c0   : > { %v439_v14 = vpop.xlane.xlu1 %438 }
 0x1c1   : > { %v427_v15 = vrot.slane %v426_v12, 2  ;;  %v440_v16 = vrot.slane %v439_v14, 4  ;;  %v414_v17 = vrot.slane %v413_v13, 1 }
 0x1c3   : > { %v441_v18 = vadd.f32 %v440_v16, %v439_v14  ;;  %v415_v19 = vadd.f32 %v414_v17, %v413_v13  ;;  %v428_v20 = vadd.f32 %v427_v15, %v426_v12 }
 0x1c4   : > { %v454_v21 = vpop.xlane.xlu1 %453 }
 0x1c5   : > { %v442_v22 = vrot.slane %v441_v18, 2  ;;  %v455_v23 = vrot.slane %v454_v21, 4  ;;  %580 = vpush %v415_v19  ;;  %v429_v24 = vrot.slane %v428_v20, 1 }
 0x1c7   : > { %v456_v25 = vadd.f32 %v455_v23, %v454_v21  ;;  %v430_v26 = vadd.f32 %v429_v24, %v428_v20  ;;  %v443_v27 = vadd.f32 %v442_v22, %v441_v18 }
 0x1c9   : > { %v457_v28 = vrot.slane %v456_v25, 2  ;;  %582 = vpush %v430_v26  ;;  %v444_v29 = vrot.slane %v443_v27, 1 }
 0x1cb   : > { %v458_v30 = vadd.f32 %v457_v28, %v456_v25  ;;  %v445_v31 = vadd.f32 %v444_v29, %v443_v27 }
 0x1cd   : > { %584 = vpush %v445_v31  ;;  %v459_v32 = vrot.slane %v458_v30, 1 }
 0x1cf   : > { %v460_v33 = vadd.f32 %v459_v32, %v458_v30 }
 0x1d1   : > { %586 = vpush %v460_v33 }
 0x1f6   : > { %s581_s10 = spop %580 }
 0x1fa   : > { %s583_s11 = spop %582 }
 0x1fb   : > { %s432_s13 = sadd.f32 %s583_s11, %s581_s10 }
 0x1fe   : > { %s585_s12 = spop %584 }
 0x1ff   : > { %s447_s14 = sadd.f32 %s585_s12, %s432_s13 }
 0x202   : > { %s587_s15 = spop %586 }
 0x203   : > { %s462_s19 = sadd.f32 %s587_s15, %s447_s14 }
 0x205   : > { %v464_v35 = vstv %s462_s19 }
 0x206   : > { %v465_v36 = vadd.f32 %v464_v35, %v463_v34 }
 0x208   : > { %467 = vst.msk [vmem:[%s713_s9] sm:$0x1] %vm292_vm3, %v465_v36 }
 0x20f   : > { %v471_v37 = vld [vmem:[%s713_s9] sm:$0x1] }
 0x210   : > { %v472_v38 = vmul.f32 0.015625, %v471_v37 }
 0x212   : > { %473 = vst.msk [vmem:[%s713_s9] sm:$0x1] %vm292_vm3, %v472_v38 }
 0x213 PF: > { %s14_s17 = sadd.s32 1, %s637_s17   ;;  %s737_s15 = smov %s633_s16 }
 0x214   : > { %p11_p5 = scmp.ge.s32.totalorder %s14_s17, 4   ;;  %s738_s16 = smov %s740_s18 }
 0x216   :  { %13 = sbr.rel (!%p11_p5) target bundleno = 2 (0x2), region = 83 }

</bundles_post_ra>
